<compile_context>
chip_gen: v7x
topology: tpu7x:2x2x1
jax: 0.10.0
libtpu: 0.0.40
codegen_flags: <defaults>
</compile_context>

<pallas_src>
import functools

import jax
import jax.numpy as jnp
from jax.experimental import pallas as pl
from jax.experimental.pallas import tpu as pltpu

LANE = 128  # TPU lane width; hidden dim is padded to a multiple of this.


def _round_up(x, m):
    return ((x + m - 1) // m) * m


def _mlp_kernel(x_ref, w1_ref, b1_ref, w2_ref, b2_ref, w3_ref, b3_ref, o_ref):
    # x arrives raw f32 [tb, input_size]; cast to bf16 in-kernel (cheap VPU
    # work, hidden under the streaming DMA) instead of a separate XLA pass.
    x = x_ref[...].astype(jnp.bfloat16)
    # Layer 1: bf16 MXU matmul, f32 accumulate, bias + ReLU in f32.
    h = jnp.dot(x, w1_ref[...], preferred_element_type=jnp.float32)
    h = jnp.maximum(h + b1_ref[...], 0.0)
    # Layer 2.
    h = jnp.dot(h.astype(jnp.bfloat16), w2_ref[...],
                preferred_element_type=jnp.float32)
    h = jnp.maximum(h + b2_ref[...], 0.0)
    # Layer 3 (logits, no activation); output lane width == num_classes.
    h = jnp.dot(h.astype(jnp.bfloat16), w3_ref[...],
                preferred_element_type=jnp.float32)
    o_ref[...] = (h + b3_ref[...]).astype(o_ref.dtype)


def prepare_params(params, compute_dtype=jnp.bfloat16):
    """One-time prep (off the hot path): transpose to [in, out], pad the hidden
    dims to 128 lanes, cast weights to bf16.  The layer-1 input dim and the
    layer-3 output (num_classes) dim are deliberately left UNpadded so the
    kernel's x block and output block carry no wasted lanes in HBM.

    params: PyTorch-convention dict:
       w1 [hidden, input], b1 [hidden]
       w2 [hidden, hidden], b2 [hidden]
       w3 [num_classes, hidden], b3 [num_classes]
    """
    hid = params["w1"].shape[0]
    nc = params["w3"].shape[0]
    hid_p = _round_up(hid, LANE)

    def pad2(w, rpad, cpad):
        return jnp.pad(w, ((0, rpad), (0, cpad)))

    w1 = pad2(params["w1"].T.astype(compute_dtype), 0, hid_p - hid)      # [in, hid_p]
    w2 = pad2(params["w2"].T.astype(compute_dtype), hid_p - hid, hid_p - hid)
    w3 = pad2(params["w3"].T.astype(compute_dtype), hid_p - hid, 0)      # [hid_p, nc]

    b1 = jnp.pad(params["b1"].astype(jnp.float32), (0, hid_p - hid)).reshape(1, -1)
    b2 = jnp.pad(params["b2"].astype(jnp.float32), (0, hid_p - hid)).reshape(1, -1)
    b3 = params["b3"].astype(jnp.float32).reshape(1, -1)                 # [1, nc]

    return {"w1": w1, "b1": b1, "w2": w2, "b2": b2, "w3": w3, "b3": b3}


@functools.partial(jax.jit, static_argnames=("tb",))
def yoga_forward(x, prepped, *, tb=None):
    """Fused forward pass.  x: [B, input_size] f32, prepped: prepare_params(...)."""
    B, in_f = x.shape
    assert prepped["w1"].shape[0] == in_f
    hid_p = prepped["w1"].shape[1]
    nc = prepped["w3"].shape[1]
    assert prepped["w2"].shape == (hid_p, hid_p)
    assert prepped["w3"].shape[0] == hid_p

    # Batch-tile selection (all static): multiple of 16 rows, capped at 1024.
    # If the batch is big enough, halve the tile so the grid has >= 2 steps --
    # required for the ("parallel",) axis to actually use both TCs on v7x.
    b16 = _round_up(max(B, 1), 16)
    if tb is None:
        tb = min(1024, b16)
        if b16 >= 32 and b16 <= tb:
            tb = _round_up(-(-b16 // 2), 16)
    b_pad = _round_up(B, tb)

    # Only the batch axis is (zero-)padded, and only when needed.  No feature
    # padding and no dtype cast in the wrapper -- the kernel handles both.
    xp = x if b_pad == B else jnp.pad(x, ((0, b_pad - B), (0, 0)))

    grid = (b_pad // tb,)

    def resident(a):
        # Whole-array block with a constant index_map: DMA'd once, then stays
        # VMEM-resident (Pallas skips re-copies when the block index repeats).
        return pl.BlockSpec(a.shape, lambda i: (0,) * a.ndim)

    out = pl.pallas_call(
        _mlp_kernel,
        out_shape=jax.ShapeDtypeStruct((b_pad, nc), jnp.float32),
        grid_spec=pltpu.PrefetchScalarGridSpec(
            num_scalar_prefetch=0,
            grid=grid,
            in_specs=[
                # x streamed in raw f32; last dim == full array dim -> legal.
                pl.BlockSpec((tb, in_f), lambda i: (i, 0)),
                resident(prepped["w1"]), resident(prepped["b1"]),
                resident(prepped["w2"]), resident(prepped["b2"]),
                resident(prepped["w3"]), resident(prepped["b3"]),
            ],
            # Narrow (num_classes-wide) output: 8x fewer HBM bytes than the old
            # 128-wide slab; masked vst is the cheaper trade at mem-bound.
            out_specs=pl.BlockSpec((tb, nc), lambda i: (i, 0)),
        ),
        compiler_params=pltpu.CompilerParams(
            dimension_semantics=("parallel",)),   # megacore sharding on v7x
    )(xp, prepped["w1"], prepped["b1"], prepped["w2"], prepped["b2"],
      prepped["w3"], prepped["b3"])

    # Only a batch slice remains, and only if the batch was actually padded.
    return out if b_pad == B else out[:B]


def init_params(key, input_size, hidden_size, num_classes):
    """Deterministic Kaiming-uniform-style init matching nn.Linear shapes."""
    ks = jax.random.split(key, 6)

    def lin(kw, kb, fan_in, fan_out):
        bound = 1.0 / jnp.sqrt(fan_in)
        w = jax.random.uniform(kw, (fan_out, fan_in), jnp.float32, -bound, bound)
        b = jax.random.uniform(kb, (fan_out,), jnp.float32, -bound, bound)
        return w, b

    w1, b1 = lin(ks[0], ks[1], input_size, hidden_size)
    w2, b2 = lin(ks[2], ks[3], hidden_size, hidden_size)
    w3, b3 = lin(ks[4], ks[5], hidden_size, num_classes)
    return {"w1": w1, "b1": b1, "w2": w2, "b2": b2, "w3": w3, "b3": b3}


def _reference(x, params):
    # Mirrors the kernel's bf16-multiply / f32-accumulate path.
    bf = lambda a: a.astype(jnp.bfloat16).astype(jnp.float32)
    h = jnp.maximum(bf(x) @ bf(params["w1"].T) + params["b1"], 0.0)
    h = jnp.maximum(bf(h) @ bf(params["w2"].T) + params["b2"], 0.0)
    return bf(h) @ bf(params["w3"].T) + params["b3"]


if __name__ == "__main__":
    key = jax.random.PRNGKey(0)
    k_x1, k_x2, k_p = jax.random.split(key, 3)

    input_size, hidden_size, num_classes = 32, 64, 16
    params = init_params(k_p, input_size, hidden_size, num_classes)
    prepped = prepare_params(params)               # one-time, off hot path

    # Case 1: tiny batch (single grid step).
    x1 = jax.random.normal(k_x1, (8, input_size), jnp.float32)
    out1 = jax.block_until_ready(yoga_forward(x1, prepped))
    ref1 = _reference(x1, params)
    assert out1.shape == (8, num_classes)
    assert jnp.allclose(out1, ref1, atol=1e-2, rtol=1e-2), float(
        jnp.max(jnp.abs(out1 - ref1)))

    # Case 2: ragged batch exercising multi-tile grid + batch-padding path.
    x2 = jax.random.normal(k_x2, (40, input_size), jnp.float32)
    out2 = jax.block_until_ready(yoga_forward(x2, prepped))
    ref2 = _reference(x2, params)
    assert out2.shape == (40, num_classes)
    assert jnp.allclose(out2, ref2, atol=1e-2, rtol=1e-2), float(
        jnp.max(jnp.abs(out2 - ref2)))

    print("KERNEL_OK")
</pallas_src>

<mosaic_0001>
module attributes {stable_mosaic.version = 11 : i64} {
  func.func @_mlp_kernel(%arg0: i32, %arg1: memref<16x32xf32, #tpu.memory_space<vmem>>, %arg2: memref<32x128xbf16, #tpu.memory_space<vmem>>, %arg3: memref<1x128xf32, #tpu.memory_space<vmem>>, %arg4: memref<128x128xbf16, #tpu.memory_space<vmem>>, %arg5: memref<1x128xf32, #tpu.memory_space<vmem>>, %arg6: memref<128x16xbf16, #tpu.memory_space<vmem>>, %arg7: memref<1x16xf32, #tpu.memory_space<vmem>>, %arg8: memref<16x16xf32, #tpu.memory_space<vmem>>) attributes {dimension_semantics = [#tpu.dimension_semantics<parallel>], iteration_bounds = array<i64: 1>, scalar_prefetch = 0 : i64, scratch_operands = 0 : i64, tpu.core_type = #tpu.core_type<tc>, window_params = [{transform_indices = @transform_0, window_bounds = array<i64: 16, 32>}, {pipeline_mode = #tpu.pipeline_mode<synchronous>, transform_indices = @transform_1, window_bounds = array<i64: 32, 128>}, {pipeline_mode = #tpu.pipeline_mode<synchronous>, transform_indices = @transform_2, window_bounds = array<i64: 1, 128>}, {pipeline_mode = #tpu.pipeline_mode<synchronous>, transform_indices = @transform_3, window_bounds = array<i64: 128, 128>}, {pipeline_mode = #tpu.pipeline_mode<synchronous>, transform_indices = @transform_4, window_bounds = array<i64: 1, 128>}, {pipeline_mode = #tpu.pipeline_mode<synchronous>, transform_indices = @transform_5, window_bounds = array<i64: 128, 16>}, {pipeline_mode = #tpu.pipeline_mode<synchronous>, transform_indices = @transform_6, window_bounds = array<i64: 1, 16>}, {transform_indices = @transform_7, window_bounds = array<i64: 16, 16>}]} {
    %c0 = arith.constant 0 : index
    %c0_0 = arith.constant 0 : index
    %0 = vector.load %arg1[%c0, %c0_0] : memref<16x32xf32, #tpu.memory_space<vmem>>, vector<16x32xf32>
    %1 = arith.truncf %0 : vector<16x32xf32> to vector<16x32xbf16>
    %c0_1 = arith.constant 0 : index
    %c0_2 = arith.constant 0 : index
    %2 = vector.load %arg2[%c0_1, %c0_2] : memref<32x128xbf16, #tpu.memory_space<vmem>>, vector<32x128xbf16>
    %cst = arith.constant dense<0.000000e+00> : vector<16x128xf32>
    %3 = tpu.matmul %1, %2, %cst {dimension_numbers = #tpu.dot_dimension_numbers<[1], [0], [0], [1], [0, 0, 1, 1], [], []>} : vector<16x32xbf16>, vector<32x128xbf16>, vector<16x128xf32> -> vector<16x128xf32>
    %c0_3 = arith.constant 0 : index
    %c0_4 = arith.constant 0 : index
    %4 = vector.load %arg3[%c0_3, %c0_4] : memref<1x128xf32, #tpu.memory_space<vmem>>, vector<1x128xf32>
    %5 = vector.broadcast %4 : vector<1x128xf32> to vector<16x128xf32>
    %6 = arith.addf %3, %5 : vector<16x128xf32>
    %cst_5 = arith.constant 0.000000e+00 : f32
    %7 = vector.broadcast %cst_5 : f32 to vector<16x128xf32>
    %8 = arith.maximumf %6, %7 : vector<16x128xf32>
    %9 = arith.truncf %8 : vector<16x128xf32> to vector<16x128xbf16>
    %c0_6 = arith.constant 0 : index
    %c0_7 = arith.constant 0 : index
    %10 = vector.load %arg4[%c0_6, %c0_7] : memref<128x128xbf16, #tpu.memory_space<vmem>>, vector<128x128xbf16>
    %cst_8 = arith.constant dense<0.000000e+00> : vector<16x128xf32>
    %11 = tpu.matmul %9, %10, %cst_8 {dimension_numbers = #tpu.dot_dimension_numbers<[1], [0], [0], [1], [0, 0, 1, 1], [], []>} : vector<16x128xbf16>, vector<128x128xbf16>, vector<16x128xf32> -> vector<16x128xf32>
    %c0_9 = arith.constant 0 : index
    %c0_10 = arith.constant 0 : index
    %12 = vector.load %arg5[%c0_9, %c0_10] : memref<1x128xf32, #tpu.memory_space<vmem>>, vector<1x128xf32>
    %13 = vector.broadcast %12 : vector<1x128xf32> to vector<16x128xf32>
    %14 = arith.addf %11, %13 : vector<16x128xf32>
    %cst_11 = arith.constant 0.000000e+00 : f32
    %15 = vector.broadcast %cst_11 : f32 to vector<16x128xf32>
    %16 = arith.maximumf %14, %15 : vector<16x128xf32>
    %17 = arith.truncf %16 : vector<16x128xf32> to vector<16x128xbf16>
    %c0_12 = arith.constant 0 : index
    %c0_13 = arith.constant 0 : index
    %18 = vector.load %arg6[%c0_12, %c0_13] : memref<128x16xbf16, #tpu.memory_space<vmem>>, vector<128x16xbf16>
    %cst_14 = arith.constant dense<0.000000e+00> : vector<16x16xf32>
    %19 = tpu.matmul %17, %18, %cst_14 {dimension_numbers = #tpu.dot_dimension_numbers<[1], [0], [0], [1], [0, 0, 1, 1], [], []>} : vector<16x128xbf16>, vector<128x16xbf16>, vector<16x16xf32> -> vector<16x16xf32>
    %c0_15 = arith.constant 0 : index
    %c0_16 = arith.constant 0 : index
    %20 = vector.load %arg7[%c0_15, %c0_16] : memref<1x16xf32, #tpu.memory_space<vmem>>, vector<1x16xf32>
    %21 = vector.broadcast %20 : vector<1x16xf32> to vector<16x16xf32>
    %22 = arith.addf %19, %21 : vector<16x16xf32>
    %c0_17 = arith.constant 0 : index
    %c0_18 = arith.constant 0 : index
    %23 = vector.load %arg8[%c0_17, %c0_18] : memref<16x16xf32, #tpu.memory_space<vmem>>, vector<16x16xf32>
    tpu.vector_store %arg8[%c0_17, %c0_18], %22 {strides = array<i32>} : memref<16x16xf32, #tpu.memory_space<vmem>>, vector<16x16xf32>,
    return
  }
  func.func @transform_0(%arg0: i32) -> (i32, i32) {
    %c0_i32 = arith.constant 0 : i32
    %c0_i32_0 = arith.constant 0 : i32
    return %arg0, %c0_i32 : i32, i32
  }
  func.func @transform_1(%arg0: i32) -> (i32, i32) {
    %c0_i32 = arith.constant 0 : i32
    %c0_i32_0 = arith.constant 0 : i32
    %c0_i32_1 = arith.constant 0 : i32
    return %c0_i32, %c0_i32_0 : i32, i32
  }
  func.func @transform_2(%arg0: i32) -> (i32, i32) {
    %c0_i32 = arith.constant 0 : i32
    %c0_i32_0 = arith.constant 0 : i32
    %c0_i32_1 = arith.constant 0 : i32
    return %c0_i32, %c0_i32_0 : i32, i32
  }
  func.func @transform_3(%arg0: i32) -> (i32, i32) {
    %c0_i32 = arith.constant 0 : i32
    %c0_i32_0 = arith.constant 0 : i32
    %c0_i32_1 = arith.constant 0 : i32
    return %c0_i32, %c0_i32_0 : i32, i32
  }
  func.func @transform_4(%arg0: i32) -> (i32, i32) {
    %c0_i32 = arith.constant 0 : i32
    %c0_i32_0 = arith.constant 0 : i32
    %c0_i32_1 = arith.constant 0 : i32
    return %c0_i32, %c0_i32_0 : i32, i32
  }
  func.func @transform_5(%arg0: i32) -> (i32, i32) {
    %c0_i32 = arith.constant 0 : i32
    %c0_i32_0 = arith.constant 0 : i32
    %c0_i32_1 = arith.constant 0 : i32
    return %c0_i32, %c0_i32_0 : i32, i32
  }
  func.func @transform_6(%arg0: i32) -> (i32, i32) {
    %c0_i32 = arith.constant 0 : i32
    %c0_i32_0 = arith.constant 0 : i32
    %c0_i32_1 = arith.constant 0 : i32
    return %c0_i32, %c0_i32_0 : i32, i32
  }
  func.func @transform_7(%arg0: i32) -> (i32, i32) {
    %c0_i32 = arith.constant 0 : i32
    %c0_i32_0 = arith.constant 0 : i32
    return %arg0, %c0_i32 : i32, i32
  }
}

</mosaic_0001>

<bundles_post_ra>
// kernel: yoga_forward.1
= control target key start
LH: loop header
LB: loop body
LE: loop exit
PB: predicated region body
PF: predicated region fallthrough
CT: control target
= control target key end

     0   :  { %v446_v0 = vmov 0.0   ;;  %vm447_vm0 = vmmov 0   ;;  %vm53_vm1 = vcmask 261120   ;;  %vm328_vm2 = vcmask 130048   ;;  %s587_s1 = inlined_call_operand.vmem [shape: bf16[32,128], index: 1, kind: input, shape index: {}]   ;;  %s588_s0 = inlined_call_operand.vmem [shape: f32[16,32], index: 0, kind: input, shape index: {}]   ;;  %s589_s3 = inlined_call_operand.vmem [shape: bf16[128,128], index: 3, kind: input, shape index: {}]   ;;  %s590_s5 = inlined_call_operand.vmem [shape: bf16[128,16], index: 5, kind: input, shape index: {}]   ;;  %s591_s2 = inlined_call_operand.vmem [shape: f32[1,128], index: 2, kind: input, shape index: {}]   ;;  %s592_s4 = inlined_call_operand.vmem [shape: f32[1,128], index: 4, kind: input, shape index: {}]   ;;  %s593_s6 = inlined_call_operand.vmem [shape: f32[1,16], index: 6, kind: input, shape index: {}]   ;;  %s594_s7 = inlined_call_operand.vmem [shape: f32[16,16], index: 7, kind: output, shape index: {}]  }
   0x1   :  { %378 = vmatprep.subr.bf16.mxu0 %v446_v0  ;;  %v428_v1 = vld [vmem:[%s587_s1] sm:$0xff]   ;;  %382 = vmatprep.mubr.msk.bf16.mxu0 %vm447_vm0, %v446_v0  ;;  %v429_v2 = vld [vmem:[%s587_s1 + $0x8] sm:$0xff]   ;;  %v432_v8 = vld [vmem:[%s589_s3 + $0x10] sm:$0xff]  }
   0x2   :  { %386 = vmatprep.subr.bf16.mxu1 %v446_v0  ;;  %402 = vmatprep.mubr.msk.bf16.mxu1 %vm447_vm0, %v446_v0  ;;  %v27_v3 = vld [vmem:[%s588_s0] sm:$0xff]  ;;  %v28_v4 = vld [vmem:[%s588_s0 + $0x8] sm:$0xff]  ;;  %v433_v9 = vld [vmem:[%s589_s3 + $0x18] sm:$0xff]  }
   0x3   :  { %379 = vmatpush3.bf16.msra.mxu0 %v428_v1  ;;  %v430_v5 = vld [vmem:[%s589_s3] sm:$0xff]   ;;  %v29_v6 = vpack.c.bf16 %v28_v4, %v27_v3  ;;  %v431_v7 = vld [vmem:[%s589_s3 + $0x8] sm:$0xff]   ;;  %v436_v12 = vld [vmem:[%s589_s3 + $0x30] sm:$0xff]  }
   0x4   :  { %380 = vmatprep.subr.bf16.mxu0 %v446_v0  ;;  %387 = vmatpush3.bf16.msra.mxu1 %v430_v5  ;;  %v434_v10 = vld [vmem:[%s589_s3 + $0x20] sm:$0xff]   ;;  %v435_v11 = vld [vmem:[%s589_s3 + $0x28] sm:$0xff]   ;;  %v437_v13 = vld [vmem:[%s589_s3 + $0x38] sm:$0xff]  }
   0x5   :  { %388 = vmatprep.subr.bf16.mxu1 %v446_v0  ;;  %v438_v14 = vld [vmem:[%s590_s5] sm:$0xff]   ;;  %v439_v15 = vld [vmem:[%s590_s5 + $0x8] sm:$0xff]   ;;  %v440_v16 = vld [vmem:[%s590_s5 + $0x10] sm:$0xff]  }
   0x6   :  { %v441_v17 = vld [vmem:[%s590_s5 + $0x18] sm:$0xff]   ;;  %v442_v18 = vld [vmem:[%s590_s5 + $0x20] sm:$0xff]   ;;  %v443_v19 = vld [vmem:[%s590_s5 + $0x28] sm:$0xff]  }
   0x7   :  { %381 = vmatpush3.bf16.msra.mxu0 %v429_v2  ;;  %v335_v20 = vld [vmem:[%s591_s2] ss:$0 sm:$0xff]  ;;  %v444_v30 = vld [vmem:[%s590_s5 + $0x30] sm:$0xff]   ;;  %v445_v31 = vld [vmem:[%s590_s5 + $0x38] sm:$0xff]  }
   0x8   :  { %406 = vmatprep.subr.bf16.mxu0 %v446_v0  ;;  %389 = vmatpush3.bf16.msra.mxu1 %v431_v7  ;;  %v339_v32 = vld [vmem:[%s592_s4] ss:$0 sm:$0xff] }
   0x9   :  { %390 = vmatprep.subr.bf16.mxu1 %v446_v0  ;;  %v348_v42 = vld [vmem:[%s593_s6] ss:$0 sm:$0xff] }
   0xa   :  { %383 = vmatmul.mubr.msk.bf16.vlgmr.msra.gmra.mrb[0].mxu0 %vm53_vm1, %v29_v6 }
   0xb   :  { %422 = vmatprep.mubr.msk.bf16.mxu0 %vm447_vm0, %v446_v0  ;;  %407 = vmatpush3.bf16.msra.mxu0 %v438_v14 }
   0xc   :  { %391 = vmatpush3.bf16.msra.mxu1 %v432_v8  ;;  %408 = vmatprep.subr.bf16.mxu0 %v446_v0 }
   0xd   :  { %392 = vmatprep.subr.bf16.mxu1 %v446_v0 }
   0xf   :  { %409 = vmatpush3.bf16.msra.mxu0 %v439_v15 }
  0x10   :  { %393 = vmatpush3.bf16.msra.mxu1 %v433_v9  ;;  %410 = vmatprep.subr.bf16.mxu0 %v446_v0 }
  0x11   :  { %394 = vmatprep.subr.bf16.mxu1 %v446_v0 }
  0x13   :  { %411 = vmatpush3.bf16.msra.mxu0 %v440_v16 }
  0x14   :  { %395 = vmatpush3.bf16.msra.mxu1 %v434_v10  ;;  %412 = vmatprep.subr.bf16.mxu0 %v446_v0 }
  0x15   :  { %396 = vmatprep.subr.bf16.mxu1 %v446_v0 }
  0x17   :  { %413 = vmatpush3.bf16.msra.mxu0 %v441_v17 }
  0x18   :  { %397 = vmatpush3.bf16.msra.mxu1 %v435_v11  ;;  %414 = vmatprep.subr.bf16.mxu0 %v446_v0 }
  0x19   :  { %398 = vmatprep.subr.bf16.mxu1 %v446_v0 }
  0x1b   :  { %415 = vmatpush3.bf16.msra.mxu0 %v442_v18 }
  0x1c   :  { %399 = vmatpush3.bf16.msra.mxu1 %v436_v12  ;;  %416 = vmatprep.subr.bf16.mxu0 %v446_v0 }
  0x1d   :  { %400 = vmatprep.subr.bf16.mxu1 %v446_v0 }
  0x1f   :  { %417 = vmatpush3.bf16.msra.mxu0 %v443_v19 }
  0x20   :  { %401 = vmatpush3.bf16.msra.mxu1 %v437_v13  ;;  %418 = vmatprep.subr.bf16.mxu0 %v446_v0 }
  0x23   :  { %419 = vmatpush3.bf16.msra.mxu0 %v444_v30 }
  0x24   :  { %420 = vmatprep.subr.bf16.mxu0 %v446_v0 }
  0x27   :  { %421 = vmatpush3.bf16.msra.mxu0 %v445_v31 }
  0xdd   :  { %v91_v21 = vpop.f32.mrb[0].mxu0 }
  0xde   :  { %v92_v22 = vadd.f32 %v335_v20, %v91_v21  ;;  %v384_v23 = vpop.f32.mrb[1].mxu0 }
  0xdf   :  { %v94_v24 = vpop.f32.mrb[2].mxu0 }
  0xe0   :  { %v95_v25 = vadd.f32 %v335_v20, %v94_v24  ;;  %v385_v26 = vpop.f32.mrb[3].mxu0  ;;  %v98_v27 = vmax.f32 %v92_v22, 0.0 }
  0xe2   :  { %v99_v28 = vmax.f32 %v95_v25, 0.0 }
  0xe4   :  { %v100_v29 = vpack.c.bf16 %v99_v28, %v98_v27 }
  0xe6   :  { %403 = vmatmul.mubr.bf16.vlgmr.msra.gmra.mrb[0].mxu1 %v100_v29 }
 0x1b9   :  { %v206_v33 = vpop.f32.mrb[0].mxu1 }
 0x1ba   :  { %v207_v34 = vadd.f32 %v339_v32, %v206_v33  ;;  %v404_v35 = vpop.f32.mrb[1].mxu1 }
 0x1bb   :  { %v209_v36 = vpop.f32.mrb[2].mxu1 }
 0x1bc   :  { %v210_v37 = vadd.f32 %v339_v32, %v209_v36  ;;  %v405_v38 = vpop.f32.mrb[3].mxu1  ;;  %v213_v39 = vmax.f32 %v207_v34, 0.0 }
 0x1be   :  { %v214_v40 = vmax.f32 %v210_v37, 0.0 }
 0x1c0   :  { %v215_v41 = vpack.c.bf16 %v214_v40, %v213_v39 }
 0x1c2   :  { %423 = vmatmul.mubr.bf16.vlgmr.msra.gmra.mrb[4].mxu0 %v215_v41 }
 0x295   :  { %v321_v43 = vpop.f32.mrb[4].mxu0 }
 0x296   :  { %v322_v44 = vadd.f32 %v348_v42, %v321_v43  ;;  %v424_v45 = vpop.f32.mrb[5].mxu0 }
 0x297   :  { %v324_v46 = vpop.f32.mrb[6].mxu0 }
 0x298   :  { %329 = vst.msk [vmem:[%s594_s7] sm:$0xff] %vm328_vm2, %v322_v44  ;;  %v325_v47 = vadd.f32 %v348_v42, %v324_v46  ;;  %v425_v48 = vpop.f32.mrb[7].mxu0 }
 0x29a   :  { %330 = vst.msk [vmem:[%s594_s7 + $0x8] sm:$0xff] %vm328_vm2, %v325_v47 }

</bundles_post_ra>
